<compile_context>
chip_gen: v7x
topology: tpu7x:2x2x1
jax: 0.10.0
libtpu: 0.0.40
codegen_flags: <defaults>
</compile_context>

<pallas_src>
import jax
import jax.numpy as jnp
from jax.experimental import pallas as pl
from jax.experimental.pallas import tpu as pltpu


def _cdiv(a, b):
    return (a + b - 1) // b


def _round_up(a, m):
    return _cdiv(a, m) * m


def _linear_kernel(x_ref, wt_ref, b_ref, o_ref):
    x = x_ref[...]            # (tb, D)
    wt = wt_ref[...]          # (D, N) resident across grid steps
    if x.dtype != wt.dtype:   # bf16 weights: cast activations on the VPU (cheap)
        x = x.astype(wt.dtype)
    acc = jnp.dot(x, wt, preferred_element_type=jnp.float32)   # (tb, N) f32 on MXU
    o_ref[...] = (acc + b_ref[...]).astype(o_ref.dtype)


def classifier_forward(x, w_t, b2, *, block_b=512):
    """Linear head forward.

    x:   (B, D) activations (f32 or bf16)
    w_t: (D, N) weight, pre-transposed once at param-prep time (f32 or bf16)
    b2:  (1, N) f32 bias row (pre-prepared)
    returns (B, N) in x.dtype
    """
    B, D = x.shape
    Dw, N = w_t.shape
    assert D == Dw, (D, Dw)
    assert b2.shape == (1, N), b2.shape

    # Batch tile. Small B: one full-extent block (exact, no (8,128) constraint).
    # Large B: even number of grid steps (v7x megacore balance), tb multiple of 8;
    # the partial last tile is handled by Pallas' masked block reads/writes.
    if B <= block_b:
        tb = B
    else:
        n_steps = _cdiv(B, block_b)
        if n_steps % 2:
            n_steps += 1          # v7x: 2 TensorCores -> balanced parallel axis
        tb = _round_up(_cdiv(B, n_steps), 8)
    grid = (pl.cdiv(B, tb),)

    x_bytes = jnp.dtype(x.dtype).itemsize
    w_bytes = jnp.dtype(w_t.dtype).itemsize
    cost = pl.CostEstimate(
        flops=2 * B * N * D,
        transcendentals=0,
        bytes_accessed=(B * D * x_bytes + D * N * w_bytes + N * 4
                        + B * N * x_bytes),
    )

    # Scoped-VMEM estimate (lane dim pads to 128 in VMEM); only override the
    # compiler default when it would blow the v5e 16 MiB scoped limit.
    n_pad = _round_up(N, 128)
    est = 2 * (tb * D * x_bytes + D * n_pad * w_bytes + tb * n_pad * x_bytes) \
        + (2 << 20)
    vmem_limit = int(min(est, 64 << 20)) if est > (16 << 20) else None

    return pl.pallas_call(
        _linear_kernel,
        out_shape=jax.ShapeDtypeStruct((B, N), x.dtype),
        grid_spec=pltpu.PrefetchScalarGridSpec(
            num_scalar_prefetch=0,
            grid=grid,
            in_specs=[
                pl.BlockSpec((tb, D), lambda i: (i, 0)),   # x: tiled over batch
                pl.BlockSpec((D, N), lambda i: (0, 0)),    # w_t: resident
                pl.BlockSpec((1, N), lambda i: (0, 0)),    # bias row: resident
            ],
            out_specs=pl.BlockSpec((tb, N), lambda i: (i, 0)),
        ),
        compiler_params=pltpu.CompilerParams(
            dimension_semantics=("parallel",),
            vmem_limit_bytes=vmem_limit,
        ),
        cost_estimate=cost,
    )(x, w_t, b2)


def init_classifier_params(key, input_dim=2048, num_classes=14, dtype=jnp.float32):
    # Deterministic init mimicking nn.Linear default (uniform in +-1/sqrt(fan_in)).
    kw, kb = jax.random.split(key)
    bound = 1.0 / jnp.sqrt(jnp.asarray(input_dim, dtype))
    w = jax.random.uniform(kw, (num_classes, input_dim), dtype, -bound, bound)
    b = jax.random.uniform(kb, (num_classes,), dtype, -bound, bound)
    return w, b


def prepare_classifier_params(w, b):
    """One-time layout prep (hoisted out of the forward): (N,D)->(D,N), bias->(1,N) f32."""
    n, d = w.shape
    w_t = jnp.asarray(w).T.reshape(d, n)            # (D, N), done once offline
    b2 = jnp.asarray(b).reshape(1, n).astype(jnp.float32)
    return w_t, b2


if __name__ == "__main__":
    key = jax.random.PRNGKey(0)
    k_x, k_p, k_x2 = jax.random.split(key, 3)

    input_dim, num_classes = 2048, 14
    w, b = init_classifier_params(k_p, input_dim, num_classes)
    w_t, b2 = prepare_classifier_params(w, b)                 # one-time prep

    # --- Test 1: small batch, f32 weights, single full-extent block (exact path).
    batch = 8
    x = jax.random.normal(k_x, (batch, input_dim), jnp.float32)
    out = classifier_forward(x, w_t, b2)
    jax.block_until_ready(out)
    ref = x @ w.T + b
    assert out.shape == (batch, num_classes)
    assert jnp.allclose(out, ref, atol=1e-4, rtol=1e-4)

    # --- Test 2: larger, non-divisible batch; bf16 weights; gridded path with a
    #             partial (masked) last tile and an even number of grid steps.
    batch2 = 600
    x2 = jax.random.normal(k_x2, (batch2, input_dim), jnp.float32)
    w_t_bf16, b2_bf16 = prepare_classifier_params(w.astype(jnp.bfloat16), b)
    out2 = classifier_forward(x2, w_t_bf16, b2_bf16, block_b=256)
    jax.block_until_ready(out2)
    ref2 = x2 @ w.T + b
    assert out2.shape == (batch2, num_classes)
    assert jnp.allclose(out2, ref2, atol=2e-2, rtol=2e-2)

    print("KERNEL_OK")
</pallas_src>

<mosaic_0001>
module attributes {stable_mosaic.version = 11 : i64} {
  func.func @_linear_kernel(%arg0: i32, %arg1: memref<8x2048xf32, #tpu.memory_space<vmem>>, %arg2: memref<2048x14xf32, #tpu.memory_space<vmem>>, %arg3: memref<1x14xf32, #tpu.memory_space<vmem>>, %arg4: memref<8x14xf32, #tpu.memory_space<vmem>>) attributes {dimension_semantics = [#tpu.dimension_semantics<parallel>], iteration_bounds = array<i64: 1>, scalar_prefetch = 0 : i64, scratch_operands = 0 : i64, tpu.core_type = #tpu.core_type<tc>, window_params = [{transform_indices = @transform_0, window_bounds = array<i64: 8, 2048>}, {pipeline_mode = #tpu.pipeline_mode<synchronous>, transform_indices = @transform_1, window_bounds = array<i64: 2048, 14>}, {pipeline_mode = #tpu.pipeline_mode<synchronous>, transform_indices = @transform_2, window_bounds = array<i64: 1, 14>}, {transform_indices = @transform_3, window_bounds = array<i64: 8, 14>}]} {
    %c0 = arith.constant 0 : index
    %c0_0 = arith.constant 0 : index
    %0 = vector.load %arg1[%c0, %c0_0] : memref<8x2048xf32, #tpu.memory_space<vmem>>, vector<8x2048xf32>
    %c0_1 = arith.constant 0 : index
    %c0_2 = arith.constant 0 : index
    %1 = vector.load %arg2[%c0_1, %c0_2] : memref<2048x14xf32, #tpu.memory_space<vmem>>, vector<2048x14xf32>
    %cst = arith.constant dense<0.000000e+00> : vector<8x14xf32>
    %2 = tpu.matmul %0, %1, %cst {dimension_numbers = #tpu.dot_dimension_numbers<[1], [0], [0], [1], [0, 0, 1, 1], [], []>} : vector<8x2048xf32>, vector<2048x14xf32>, vector<8x14xf32> -> vector<8x14xf32>
    %c0_3 = arith.constant 0 : index
    %c0_4 = arith.constant 0 : index
    %3 = vector.load %arg3[%c0_3, %c0_4] : memref<1x14xf32, #tpu.memory_space<vmem>>, vector<1x14xf32>
    %4 = vector.broadcast %3 : vector<1x14xf32> to vector<8x14xf32>
    %5 = arith.addf %2, %4 : vector<8x14xf32>
    %c0_5 = arith.constant 0 : index
    %c0_6 = arith.constant 0 : index
    %6 = vector.load %arg4[%c0_5, %c0_6] : memref<8x14xf32, #tpu.memory_space<vmem>>, vector<8x14xf32>
    tpu.vector_store %arg4[%c0_5, %c0_6], %5 {strides = array<i32>} : memref<8x14xf32, #tpu.memory_space<vmem>>, vector<8x14xf32>,
    return
  }
  func.func @transform_0(%arg0: i32) -> (i32, i32) {
    %c0_i32 = arith.constant 0 : i32
    %c0_i32_0 = arith.constant 0 : i32
    return %arg0, %c0_i32 : i32, i32
  }
  func.func @transform_1(%arg0: i32) -> (i32, i32) {
    %c0_i32 = arith.constant 0 : i32
    %c0_i32_0 = arith.constant 0 : i32
    %c0_i32_1 = arith.constant 0 : i32
    return %c0_i32, %c0_i32_0 : i32, i32
  }
  func.func @transform_2(%arg0: i32) -> (i32, i32) {
    %c0_i32 = arith.constant 0 : i32
    %c0_i32_0 = arith.constant 0 : i32
    %c0_i32_1 = arith.constant 0 : i32
    return %c0_i32, %c0_i32_0 : i32, i32
  }
  func.func @transform_3(%arg0: i32) -> (i32, i32) {
    %c0_i32 = arith.constant 0 : i32
    %c0_i32_0 = arith.constant 0 : i32
    return %arg0, %c0_i32 : i32, i32
  }
}

</mosaic_0001>

<bundles_post_ra>
// kernel: tpu_custom_call.1
= control target key start
LH: loop header
LB: loop body
LE: loop exit
PB: predicated region body
PF: predicated region fallthrough
CT: control target
= control target key end

     0   :  { %s2284_s0 = inlined_call_operand.vmem [shape: f32[8,2048], index: 0, kind: input, shape index: {}]   ;;  %s2285_s1 = inlined_call_operand.vmem [shape: f32[2048,14], index: 1, kind: input, shape index: {}]   ;;  %s2286_s2 = inlined_call_operand.vmem [shape: f32[1,14], index: 2, kind: input, shape index: {}]   ;;  %s2287_s3 = inlined_call_operand.hbm [shape: f32[8,14], index: 3, kind: output, shape index: {}]  }
   0x1   :  { %v47_v0 = vld [vmem:[%s2285_s1 + $0x80] sm:$0xff]  ;;  %v48_v1 = vld [vmem:[%s2285_s1 + $0x88] sm:$0xff]  ;;  %v49_v11 = vld [vmem:[%s2285_s1 + $0x90] sm:$0xff] }
   0x2   :  { %v31_v2 = vld [vmem:[%s2285_s1] sm:$0xff]  ;;  %v1151_v3 = vpack.c.bf16 %v48_v1, %v47_v0  ;;  %v32_v4 = vld [vmem:[%s2285_s1 + $0x8] sm:$0xff]  ;;  %v50_v13 = vld [vmem:[%s2285_s1 + $0x98] sm:$0xff] }
   0x3   :  { %v79_v5 = vld [vmem:[%s2285_s1 + $0x180] sm:$0xff]  ;;  %v80_v6 = vld [vmem:[%s2285_s1 + $0x188] sm:$0xff]  ;;  %v1153_v7 = vpack.c.bf16 %v32_v4, %v31_v2  ;;  %v33_v14 = vld [vmem:[%s2285_s1 + $0x10] sm:$0xff]  ;;  %v1155_v16 = vpack.c.bf16 %v50_v13, %v49_v11 }
   0x4   :  { %v1183_v8 = vpack.c.bf16 %v80_v6, %v79_v5  ;;  %v63_v9 = vld [vmem:[%s2285_s1 + $0x100] sm:$0xff]  ;;  %v64_v10 = vld [vmem:[%s2285_s1 + $0x108] sm:$0xff]  ;;  %1152 = vmatprep.subr.bf16.mxu0 %v1151_v3  ;;  %v34_v15 = vld [vmem:[%s2285_s1 + $0x18] sm:$0xff] }
   0x5   :  { %v1185_v12 = vpack.c.bf16 %v64_v10, %v63_v9  ;;  %1154 = vmatpush3.bf16.msra.mxu0 %v1153_v7  ;;  %v1157_v17 = vpack.c.bf16 %v34_v15, %v33_v14  ;;  %v81_v18 = vld [vmem:[%s2285_s1 + $0x190] sm:$0xff]  ;;  %v82_v19 = vld [vmem:[%s2285_s1 + $0x198] sm:$0xff]  ;;  %v51_v23 = vld [vmem:[%s2285_s1 + $0xa0] sm:$0xff] }
   0x6   :  { %1184 = vmatprep.subr.bf16.mxu1 %v1183_v8  ;;  %v65_v20 = vld [vmem:[%s2285_s1 + $0x110] sm:$0xff]  ;;  %v1187_v21 = vpack.c.bf16 %v82_v19, %v81_v18  ;;  %v66_v22 = vld [vmem:[%s2285_s1 + $0x118] sm:$0xff]  ;;  %v52_v24 = vld [vmem:[%s2285_s1 + $0xa8] sm:$0xff]  ;;  %1156 = vmatprep.subr.bf16.mxu0 %v1155_v16 }
   0x7   :  { %1186 = vmatpush3.bf16.msra.mxu1 %v1185_v12  ;;  %v1189_v25 = vpack.c.bf16 %v66_v22, %v65_v20  ;;  %v1159_v26 = vpack.c.bf16 %v52_v24, %v51_v23  ;;  %v35_v27 = vld [vmem:[%s2285_s1 + $0x20] sm:$0xff]  ;;  %v36_v28 = vld [vmem:[%s2285_s1 + $0x28] sm:$0xff]  ;;  %v53_v35 = vld [vmem:[%s2285_s1 + $0xb0] sm:$0xff] }
   0x8   :  { %v83_v29 = vld [vmem:[%s2285_s1 + $0x1a0] sm:$0xff]  ;;  %1188 = vmatprep.subr.bf16.mxu1 %v1187_v21  ;;  %v84_v30 = vld [vmem:[%s2285_s1 + $0x1a8] sm:$0xff]  ;;  %v1161_v33 = vpack.c.bf16 %v36_v28, %v35_v27  ;;  %v54_v36 = vld [vmem:[%s2285_s1 + $0xb8] sm:$0xff] }
   0x9   :  { %v67_v31 = vld [vmem:[%s2285_s1 + $0x120] sm:$0xff]  ;;  %v68_v32 = vld [vmem:[%s2285_s1 + $0x128] sm:$0xff]  ;;  %1158 = vmatpush3.bf16.msra.mxu0 %v1157_v17  ;;  %v1191_v34 = vpack.c.bf16 %v84_v30, %v83_v29  ;;  %v37_v37 = vld [vmem:[%s2285_s1 + $0x30] sm:$0xff]  ;;  %v1163_v39 = vpack.c.bf16 %v54_v36, %v53_v35 }
   0xa   :  { %1160 = vmatprep.subr.bf16.mxu0 %v1159_v26  ;;  %v1193_v38 = vpack.c.bf16 %v68_v32, %v67_v31  ;;  %v38_v40 = vld [vmem:[%s2285_s1 + $0x38] sm:$0xff]  ;;  %v85_v41 = vld [vmem:[%s2285_s1 + $0x1b0] sm:$0xff]  ;;  %v55_v46 = vld [vmem:[%s2285_s1 + $0xc0] sm:$0xff] }
   0xb   :  { %1190 = vmatpush3.bf16.msra.mxu1 %v1189_v25  ;;  %v86_v42 = vld [vmem:[%s2285_s1 + $0x1b8] sm:$0xff]  ;;  %v69_v44 = vld [vmem:[%s2285_s1 + $0x130] sm:$0xff]  ;;  %v56_v47 = vld [vmem:[%s2285_s1 + $0xc8] sm:$0xff]  ;;  %v1165_v48 = vpack.c.bf16 %v38_v40, %v37_v37 }
   0xc   :  { %1192 = vmatprep.subr.bf16.mxu1 %v1191_v34  ;;  %v1195_v43 = vpack.c.bf16 %v86_v42, %v85_v41  ;;  %v70_v45 = vld [vmem:[%s2285_s1 + $0x138] sm:$0xff]  ;;  %v87_v49 = vld [vmem:[%s2285_s1 + $0x1c0] sm:$0xff]  ;;  %v88_v50 = vld [vmem:[%s2285_s1 + $0x1c8] sm:$0xff]  ;;  %v1167_v52 = vpack.c.bf16 %v56_v47, %v55_v46 }
   0xd   :  { %1162 = vmatpush3.bf16.msra.mxu0 %v1161_v33  ;;  %v1197_v51 = vpack.c.bf16 %v70_v45, %v69_v44  ;;  %v39_v53 = vld [vmem:[%s2285_s1 + $0x40] sm:$0xff]  ;;  %v40_v54 = vld [vmem:[%s2285_s1 + $0x48] sm:$0xff]  ;;  %v1199_v56 = vpack.c.bf16 %v88_v50, %v87_v49  ;;  %v57_v58 = vld [vmem:[%s2285_s1 + $0xd0] sm:$0xff] }
   0xe   :  { %1164 = vmatprep.subr.bf16.mxu0 %v1163_v39  ;;  %v71_v55 = vld [vmem:[%s2285_s1 + $0x140] sm:$0xff]  ;;  %v72_v57 = vld [vmem:[%s2285_s1 + $0x148] sm:$0xff]  ;;  %v58_v59 = vld [vmem:[%s2285_s1 + $0xd8] sm:$0xff]  ;;  %v1169_v62 = vpack.c.bf16 %v40_v54, %v39_v53 }
   0xf   :  { %1194 = vmatpush3.bf16.msra.mxu1 %v1193_v38  ;;  %v89_v60 = vld [vmem:[%s2285_s1 + $0x1d0] sm:$0xff]  ;;  %v90_v61 = vld [vmem:[%s2285_s1 + $0x1d8] sm:$0xff]  ;;  %v1201_v63 = vpack.c.bf16 %v72_v57, %v71_v55  ;;  %v1171_v0 = vpack.c.bf16 %v58_v59, %v57_v58  ;;  %v59_v6 = vld [vmem:[%s2285_s1 + $0xe0] sm:$0xff] }
  0x10   :  { %1196 = vmatprep.subr.bf16.mxu1 %v1195_v43  ;;  %v41_v1 = vld [vmem:[%s2285_s1 + $0x50] sm:$0xff]  ;;  %v42_v2 = vld [vmem:[%s2285_s1 + $0x58] sm:$0xff]  ;;  %v1203_v4 = vpack.c.bf16 %v90_v61, %v89_v60  ;;  %v60_v7 = vld [vmem:[%s2285_s1 + $0xe8] sm:$0xff] }
  0x11   :  { %1166 = vmatpush3.bf16.msra.mxu0 %v1165_v48  ;;  %v73_v3 = vld [vmem:[%s2285_s1 + $0x150] sm:$0xff]  ;;  %v74_v5 = vld [vmem:[%s2285_s1 + $0x158] sm:$0xff]  ;;  %v91_v8 = vld [vmem:[%s2285_s1 + $0x1e0] sm:$0xff]  ;;  %v1173_v10 = vpack.c.bf16 %v42_v2, %v41_v1  ;;  %v1175_v14 = vpack.c.bf16 %v60_v7, %v59_v6 }
  0x12   :  { %1168 = vmatprep.subr.bf16.mxu0 %v1167_v52  ;;  %v92_v9 = vld [vmem:[%s2285_s1 + $0x1e8] sm:$0xff]  ;;  %v43_v11 = vld [vmem:[%s2285_s1 + $0x60] sm:$0xff]  ;;  %v1205_v13 = vpack.c.bf16 %v74_v5, %v73_v3  ;;  %v61_v19 = vld [vmem:[%s2285_s1 + $0xf0] sm:$0xff] }
  0x13   :  { %1198 = vmatpush3.bf16.msra.mxu1 %v1197_v51  ;;  %v44_v12 = vld [vmem:[%s2285_s1 + $0x68] sm:$0xff]  ;;  %v75_v15 = vld [vmem:[%s2285_s1 + $0x160] sm:$0xff]  ;;  %v1207_v18 = vpack.c.bf16 %v92_v9, %v91_v8  ;;  %v62_v20 = vld [vmem:[%s2285_s1 + $0xf8] sm:$0xff] }
  0x14   :  { %1200 = vmatprep.subr.bf16.mxu1 %v1199_v56  ;;  %v76_v16 = vld [vmem:[%s2285_s1 + $0x168] sm:$0xff]  ;;  %v18_v21 = vld [vmem:[%s2284_s0 + $0x18] sm:$0xff]  ;;  %v93_v22 = vld [vmem:[%s2285_s1 + $0x1f0] sm:$0xff]  ;;  %v1177_v24 = vpack.c.bf16 %v44_v12, %v43_v11  ;;  %v1179_v26 = vpack.c.bf16 %v62_v20, %v61_v19 }
  0x15   :  { %1170 = vmatpush3.bf16.msra.mxu0 %v1169_v62  ;;  %v16_v17 = vld [vmem:[%s2284_s0 + $0x8] sm:$0xff]  ;;  %v94_v23 = vld [vmem:[%s2285_s1 + $0x1f8] sm:$0xff]  ;;  %428 = vmatprep.mubr.f32.mxu1 %v18_v21  ;;  %v1209_v25 = vpack.c.bf16 %v76_v16, %v75_v15  ;;  %v45_v27 = vld [vmem:[%s2285_s1 + $0x70] sm:$0xff] }
  0x16   :  { %1172 = vmatprep.subr.bf16.mxu0 %v1171_v0  ;;  %358 = vmatprep.mubr.f32.mxu0 %v16_v17  ;;  %v46_v28 = vld [vmem:[%s2285_s1 + $0x78] sm:$0xff]  ;;  %v77_v29 = vld [vmem:[%s2285_s1 + $0x170] sm:$0xff]  ;;  %v1211_v30 = vpack.c.bf16 %v94_v23, %v93_v22  ;;  %v111_v32 = vld [vmem:[%s2285_s1 + $0x280] sm:$0xff] }
  0x17   :  { %1202 = vmatpush3.bf16.msra.mxu1 %v1201_v63  ;;  %v78_v31 = vld [vmem:[%s2285_s1 + $0x178] sm:$0xff]  ;;  %v112_v33 = vld [vmem:[%s2285_s1 + $0x288] sm:$0xff]  ;;  %v143_v34 = vld [vmem:[%s2285_s1 + $0x380] sm:$0xff]  ;;  %v1181_v36 = vpack.c.bf16 %v46_v28, %v45_v27 }
  0x18   :  { %1204 = vmatprep.subr.bf16.mxu1 %v1203_v4  ;;  %v144_v35 = vld [vmem:[%s2285_s1 + $0x388] sm:$0xff]  ;;  %v1213_v37 = vpack.c.bf16 %v78_v31, %v77_v29  ;;  %v1215_v38 = vpack.c.bf16 %v112_v33, %v111_v32  ;;  %v95_v39 = vld [vmem:[%s2285_s1 + $0x200] sm:$0xff]  ;;  %v113_v44 = vld [vmem:[%s2285_s1 + $0x290] sm:$0xff] }
  0x19   :  { %1174 = vmatpush3.bf16.msra.mxu0 %v1173_v10  ;;  %v96_v40 = vld [vmem:[%s2285_s1 + $0x208] sm:$0xff]  ;;  %v127_v41 = vld [vmem:[%s2285_s1 + $0x300] sm:$0xff]  ;;  %v1247_v42 = vpack.c.bf16 %v144_v35, %v143_v34  ;;  %v114_v45 = vld [vmem:[%s2285_s1 + $0x298] sm:$0xff] }
  0x1a   :  { %1176 = vmatprep.subr.bf16.mxu0 %v1175_v14  ;;  %v128_v43 = vld [vmem:[%s2285_s1 + $0x308] sm:$0xff]  ;;  %v145_v46 = vld [vmem:[%s2285_s1 + $0x390] sm:$0xff]  ;;  %v146_v47 = vld [vmem:[%s2285_s1 + $0x398] sm:$0xff]  ;;  %v1217_v49 = vpack.c.bf16 %v96_v40, %v95_v39  ;;  %v1219_v52 = vpack.c.bf16 %v114_v45, %v113_v44 }
  0x1b   :  { %1206 = vmatpush3.bf16.msra.mxu1 %v1205_v13  ;;  %v15_v48 = vld [vmem:[%s2284_s0] sm:$0xff]  ;;  %v17_v50 = vld [vmem:[%s2284_s0 + $0x10] sm:$0xff]  ;;  %v1249_v51 = vpack.c.bf16 %v128_v43, %v127_v41  ;;  %v98_v54 = vld [vmem:[%s2285_s1 + $0x218] sm:$0xff]  ;;  %v1251_v56 = vpack.c.bf16 %v146_v47, %v145_v46 }
  0x1c   :  { %1208 = vmatprep.subr.bf16.mxu1 %v1207_v18  ;;  %v97_v53 = vld [vmem:[%s2285_s1 + $0x210] sm:$0xff]  ;;  %v130_v57 = vld [vmem:[%s2285_s1 + $0x318] sm:$0xff]  ;;  %v115_v58 = vld [vmem:[%s2285_s1 + $0x2a0] sm:$0xff] }
  0x1d   :  { %1178 = vmatpush3.bf16.msra.mxu0 %v1177_v24  ;;  %v129_v55 = vld [vmem:[%s2285_s1 + $0x310] sm:$0xff]  ;;  %v116_v59 = vld [vmem:[%s2285_s1 + $0x2a8] sm:$0xff]  ;;  %v147_v60 = vld [vmem:[%s2285_s1 + $0x3a0] sm:$0xff]  ;;  %v1221_v62 = vpack.c.bf16 %v98_v54, %v97_v53 }
  0x1e   :  { %1180 = vmatprep.subr.bf16.mxu0 %v1179_v26  ;;  %v148_v61 = vld [vmem:[%s2285_s1 + $0x3a8] sm:$0xff]  ;;  %v1253_v63 = vpack.c.bf16 %v130_v57, %v129_v55  ;;  %v1223_v0 = vpack.c.bf16 %v116_v59, %v115_v58  ;;  %v99_v1 = vld [vmem:[%s2285_s1 + $0x220] sm:$0xff]  ;;  %v117_v6 = vld [vmem:[%s2285_s1 + $0x2b0] sm:$0xff] }
  0x1f   :  { %1210 = vmatpush3.bf16.msra.mxu1 %v1209_v25  ;;  %v100_v2 = vld [vmem:[%s2285_s1 + $0x228] sm:$0xff]  ;;  %v131_v3 = vld [vmem:[%s2285_s1 + $0x320] sm:$0xff]  ;;  %v1255_v4 = vpack.c.bf16 %v148_v61, %v147_v60  ;;  %v118_v7 = vld [vmem:[%s2285_s1 + $0x2b8] sm:$0xff] }
  0x20   :  { %1212 = vmatprep.subr.bf16.mxu1 %v1211_v30  ;;  %v132_v5 = vld [vmem:[%s2285_s1 + $0x328] sm:$0xff]  ;;  %v149_v8 = vld [vmem:[%s2285_s1 + $0x3b0] sm:$0xff]  ;;  %v150_v9 = vld [vmem:[%s2285_s1 + $0x3b8] sm:$0xff]  ;;  %v1225_v10 = vpack.c.bf16 %v100_v2, %v99_v1  ;;  %v1227_v12 = vpack.c.bf16 %v118_v7, %v117_v6 }
  0x21   :  { %1182 = vmatpush3.bf16.msra.mxu0 %v1181_v36  ;;  %v1257_v11 = vpack.c.bf16 %v132_v5, %v131_v3  ;;  %v101_v13 = vld [vmem:[%s2285_s1 + $0x230] sm:$0xff]  ;;  %v102_v14 = vld [vmem:[%s2285_s1 + $0x238] sm:$0xff]  ;;  %v1259_v16 = vpack.c.bf16 %v150_v9, %v149_v8  ;;  %v119_v18 = vld [vmem:[%s2285_s1 + $0x2c0] sm:$0xff] }
  0x22   :  { %1216 = vmatprep.subr.bf16.mxu0 %v1215_v38  ;;  %v133_v15 = vld [vmem:[%s2285_s1 + $0x330] sm:$0xff]  ;;  %v134_v17 = vld [vmem:[%s2285_s1 + $0x338] sm:$0xff]  ;;  %v120_v19 = vld [vmem:[%s2285_s1 + $0x2c8] sm:$0xff]  ;;  %v1229_v22 = vpack.c.bf16 %v102_v14, %v101_v13 }
  0x23   :  { %1214 = vmatpush3.bf16.msra.mxu1 %v1213_v37  ;;  %v151_v20 = vld [vmem:[%s2285_s1 + $0x3c0] sm:$0xff]  ;;  %v152_v21 = vld [vmem:[%s2285_s1 + $0x3c8] sm:$0xff]  ;;  %v1261_v25 = vpack.c.bf16 %v134_v17, %v133_v15  ;;  %v1231_v26 = vpack.c.bf16 %v120_v19, %v119_v18  ;;  %v22_v29 = vld [vmem:[%s2284_s0 + $0x38] sm:$0xff] }
  0x24   :  { %1248 = vmatprep.subr.bf16.mxu1 %v1247_v42  ;;  %359 = vmatmul.mubr.f32.vlgmr.msra.gmra.mrb[0].mxu0 %v15_v48  ;;  %v103_v23 = vld [vmem:[%s2285_s1 + $0x240] sm:$0xff]  ;;  %v20_v24 = vld [vmem:[%s2284_s0 + $0x28] sm:$0xff]  ;;  %v1263_v30 = vpack.c.bf16 %v152_v21, %v151_v20  ;;  %v121_v32 = vld [vmem:[%s2285_s1 + $0x2d0] sm:$0xff] }
  0x25   :  { %1218 = vmatpush3.bf16.msra.mxu0 %v1217_v49  ;;  %v104_v27 = vld [vmem:[%s2285_s1 + $0x248] sm:$0xff]  ;;  %v135_v28 = vld [vmem:[%s2285_s1 + $0x340] sm:$0xff]  ;;  %v122_v33 = vld [vmem:[%s2285_s1 + $0x2d8] sm:$0xff]  ;;  %498 = vmatprep.mubr.f32.mxu0 %v20_v24 }
  0x26   :  { %429 = vmatmul.mubr.f32.vlgmr.msra.gmra.mrb[0].mxu1 %v17_v50  ;;  %1220 = vmatprep.subr.bf16.mxu0 %v1219_v52  ;;  %v136_v31 = vld [vmem:[%s2285_s1 + $0x348] sm:$0xff]  ;;  %v153_v34 = vld [vmem:[%s2285_s1 + $0x3d0] sm:$0xff]  ;;  %v154_v35 = vld [vmem:[%s2285_s1 + $0x3d8] sm:$0xff]  ;;  %v1233_v36 = vpack.c.bf16 %v104_v27, %v103_v23  ;;  %v1235_v38 = vpack.c.bf16 %v122_v33, %v121_v32 }
  0x27   :  { %1250 = vmatpush3.bf16.msra.mxu1 %v1249_v51  ;;  %568 = vmatprep.mubr.f32.mxu1 %v22_v29  ;;  %v1265_v37 = vpack.c.bf16 %v136_v31, %v135_v28  ;;  %v105_v39 = vld [vmem:[%s2285_s1 + $0x250] sm:$0xff]  ;;  %v106_v40 = vld [vmem:[%s2285_s1 + $0x258] sm:$0xff]  ;;  %v1267_v42 = vpack.c.bf16 %v154_v35, %v153_v34  ;;  %v123_v44 = vld [vmem:[%s2285_s1 + $0x2e0] sm:$0xff] }
  0x28   :  { %1252 = vmatprep.subr.bf16.mxu1 %v1251_v56  ;;  %v137_v41 = vld [vmem:[%s2285_s1 + $0x350] sm:$0xff]  ;;  %v138_v43 = vld [vmem:[%s2285_s1 + $0x358] sm:$0xff]  ;;  %v124_v45 = vld [vmem:[%s2285_s1 + $0x2e8] sm:$0xff]  ;;  %v1237_v48 = vpack.c.bf16 %v106_v40, %v105_v39 }
  0x29   :  { %1222 = vmatpush3.bf16.msra.mxu0 %v1221_v62  ;;  %v155_v46 = vld [vmem:[%s2285_s1 + $0x3e0] sm:$0xff]  ;;  %v156_v47 = vld [vmem:[%s2285_s1 + $0x3e8] sm:$0xff]  ;;  %v1269_v49 = vpack.c.bf16 %v138_v43, %v137_v41  ;;  %v1239_v50 = vpack.c.bf16 %v124_v45, %v123_v44  ;;  %v125_v56 = vld [vmem:[%s2285_s1 + $0x2f0] sm:$0xff] }
  0x2a   :  { %1224 = vmatprep.subr.bf16.mxu0 %v1223_v0  ;;  %v107_v51 = vld [vmem:[%s2285_s1 + $0x260] sm:$0xff]  ;;  %v108_v52 = vld [vmem:[%s2285_s1 + $0x268] sm:$0xff]  ;;  %v1271_v54 = vpack.c.bf16 %v156_v47, %v155_v46  ;;  %v126_v57 = vld [vmem:[%s2285_s1 + $0x2f8] sm:$0xff] }
  0x2b   :  { %1254 = vmatpush3.bf16.msra.mxu1 %v1253_v63  ;;  %v139_v53 = vld [vmem:[%s2285_s1 + $0x360] sm:$0xff]  ;;  %v140_v55 = vld [vmem:[%s2285_s1 + $0x368] sm:$0xff]  ;;  %v157_v58 = vld [vmem:[%s2285_s1 + $0x3f0] sm:$0xff]  ;;  %v1241_v60 = vpack.c.bf16 %v108_v52, %v107_v51  ;;  %v1243_v62 = vpack.c.bf16 %v126_v57, %v125_v56 }
  0x2c   :  { %1256 = vmatprep.subr.bf16.mxu1 %v1255_v4  ;;  %v158_v59 = vld [vmem:[%s2285_s1 + $0x3f8] sm:$0xff]  ;;  %v1273_v61 = vpack.c.bf16 %v140_v55, %v139_v53  ;;  %v109_v63 = vld [vmem:[%s2285_s1 + $0x270] sm:$0xff]  ;;  %v175_v4 = vld [vmem:[%s2285_s1 + $0x480] sm:$0xff] }
  0x2d   :  { %1226 = vmatpush3.bf16.msra.mxu0 %v1225_v10  ;;  %v110_v0 = vld [vmem:[%s2285_s1 + $0x278] sm:$0xff]  ;;  %v141_v1 = vld [vmem:[%s2285_s1 + $0x370] sm:$0xff]  ;;  %v1275_v2 = vpack.c.bf16 %v158_v59, %v157_v58  ;;  %v176_v5 = vld [vmem:[%s2285_s1 + $0x488] sm:$0xff] }
  0x2e   :  { %1228 = vmatprep.subr.bf16.mxu0 %v1227_v12  ;;  %v142_v3 = vld [vmem:[%s2285_s1 + $0x378] sm:$0xff]  ;;  %v207_v6 = vld [vmem:[%s2285_s1 + $0x580] sm:$0xff]  ;;  %v208_v7 = vld [vmem:[%s2285_s1 + $0x588] sm:$0xff]  ;;  %v1245_v8 = vpack.c.bf16 %v110_v0, %v109_v63  ;;  %v1279_v10 = vpack.c.bf16 %v176_v5, %v175_v4 }
  0x2f   :  { %1258 = vmatpush3.bf16.msra.mxu1 %v1257_v11  ;;  %v1277_v9 = vpack.c.bf16 %v142_v3, %v141_v1  ;;  %v159_v11 = vld [vmem:[%s2285_s1 + $0x400] sm:$0xff]  ;;  %v160_v12 = vld [vmem:[%s2285_s1 + $0x408] sm:$0xff]  ;;  %v1311_v14 = vpack.c.bf16 %v208_v7, %v207_v6  ;;  %v178_v17 = vld [vmem:[%s2285_s1 + $0x498] sm:$0xff] }
  0x30   :  { %1260 = vmatprep.subr.bf16.mxu1 %v1259_v16  ;;  %v191_v13 = vld [vmem:[%s2285_s1 + $0x500] sm:$0xff]  ;;  %v192_v15 = vld [vmem:[%s2285_s1 + $0x508] sm:$0xff]  ;;  %v177_v16 = vld [vmem:[%s2285_s1 + $0x490] sm:$0xff]  ;;  %v1281_v21 = vpack.c.bf16 %v160_v12, %v159_v11 }
  0x31   :  { %1230 = vmatpush3.bf16.msra.mxu0 %v1229_v22  ;;  %v209_v18 = vld [vmem:[%s2285_s1 + $0x590] sm:$0xff]  ;;  %v210_v19 = vld [vmem:[%s2285_s1 + $0x598] sm:$0xff]  ;;  %v19_v20 = vld [vmem:[%s2284_s0 + $0x20] sm:$0xff]  ;;  %v1313_v23 = vpack.c.bf16 %v192_v15, %v191_v13  ;;  %v1283_v24 = vpack.c.bf16 %v178_v17, %v177_v16 }
  0x32   :  { %1232 = vmatprep.subr.bf16.mxu0 %v1231_v26  ;;  %v21_v22 = vld [vmem:[%s2284_s0 + $0x30] sm:$0xff]  ;;  %v162_v26 = vld [vmem:[%s2285_s1 + $0x418] sm:$0xff]  ;;  %v1315_v28 = vpack.c.bf16 %v210_v19, %v209_v18  ;;  %v180_v31 = vld [vmem:[%s2285_s1 + $0x4a8] sm:$0xff] }
  0x33   :  { %1262 = vmatpush3.bf16.msra.mxu1 %v1261_v25  ;;  %v161_v25 = vld [vmem:[%s2285_s1 + $0x410] sm:$0xff]  ;;  %v194_v29 = vld [vmem:[%s2285_s1 + $0x518] sm:$0xff]  ;;  %v211_v32 = vld [vmem:[%s2285_s1 + $0x5a0] sm:$0xff] }
  0x34   :  { %1264 = vmatprep.subr.bf16.mxu1 %v1263_v30  ;;  %v193_v27 = vld [vmem:[%s2285_s1 + $0x510] sm:$0xff]  ;;  %v179_v30 = vld [vmem:[%s2285_s1 + $0x4a0] sm:$0xff]  ;;  %v212_v33 = vld [vmem:[%s2285_s1 + $0x5a8] sm:$0xff]  ;;  %v1285_v35 = vpack.c.bf16 %v162_v26, %v161_v25 }
  0x35   :  { %1234 = vmatpush3.bf16.msra.mxu0 %v1233_v36  ;;  %v24_v34 = vld [vmem:[%s2284_s0 + $0x48] sm:$0xff]  ;;  %v26_v36 = vld [vmem:[%s2284_s0 + $0x58] sm:$0xff]  ;;  %v163_v39 = vld [vmem:[%s2285_s1 + $0x420] sm:$0xff] }
  0x36   :  { %1236 = vmatprep.subr.bf16.mxu0 %v1235_v38  ;;  %v1287_v38 = vpack.c.bf16 %v180_v31, %v179_v30  ;;  %v164_v40 = vld [vmem:[%s2285_s1 + $0x428] sm:$0xff]  ;;  %v195_v41 = vld [vmem:[%s2285_s1 + $0x520] sm:$0xff]  ;;  %v181_v44 = vld [vmem:[%s2285_s1 + $0x4b0] sm:$0xff] }
  0x37   :  { %1266 = vmatpush3.bf16.msra.mxu1 %v1265_v37  ;;  %v1317_v37 = vpack.c.bf16 %v194_v29, %v193_v27  ;;  %v196_v43 = vld [vmem:[%s2285_s1 + $0x528] sm:$0xff]  ;;  %v182_v45 = vld [vmem:[%s2285_s1 + $0x4b8] sm:$0xff]  ;;  %v213_v46 = vld [vmem:[%s2285_s1 + $0x5b0] sm:$0xff] }
  0x38   :  { %1268 = vmatprep.subr.bf16.mxu1 %v1267_v42  ;;  %v1319_v42 = vpack.c.bf16 %v212_v33, %v211_v32  ;;  %v214_v47 = vld [vmem:[%s2285_s1 + $0x5b8] sm:$0xff]  ;;  %v165_v51 = vld [vmem:[%s2285_s1 + $0x430] sm:$0xff]  ;;  %v183_v56 = vld [vmem:[%s2285_s1 + $0x4c0] sm:$0xff] }
  0x39   :  { %1238 = vmatpush3.bf16.msra.mxu0 %v1237_v48  ;;  %v1289_v48 = vpack.c.bf16 %v164_v40, %v163_v39  ;;  %v166_v52 = vld [vmem:[%s2285_s1 + $0x438] sm:$0xff]  ;;  %v197_v53 = vld [vmem:[%s2285_s1 + $0x530] sm:$0xff]  ;;  %v184_v57 = vld [vmem:[%s2285_s1 + $0x4c8] sm:$0xff] }
  0x3a   :  { %1240 = vmatprep.subr.bf16.mxu0 %v1239_v50  ;;  %v1291_v50 = vpack.c.bf16 %v182_v45, %v181_v44  ;;  %v198_v55 = vld [vmem:[%s2285_s1 + $0x538] sm:$0xff]  ;;  %v215_v58 = vld [vmem:[%s2285_s1 + $0x5c0] sm:$0xff]  ;;  %v216_v59 = vld [vmem:[%s2285_s1 + $0x5c8] sm:$0xff] }
  0x3b   :  { %1270 = vmatpush3.bf16.msra.mxu1 %v1269_v49  ;;  %v1321_v49 = vpack.c.bf16 %v196_v43, %v195_v41  ;;  %v167_v63 = vld [vmem:[%s2285_s1 + $0x440] sm:$0xff]  ;;  %v168_v0 = vld [vmem:[%s2285_s1 + $0x448] sm:$0xff]  ;;  %v185_v4 = vld [vmem:[%s2285_s1 + $0x4d0] sm:$0xff] }
  0x3c   :  { %1272 = vmatprep.subr.bf16.mxu1 %v1271_v54  ;;  %v1323_v54 = vpack.c.bf16 %v214_v47, %v213_v46  ;;  %v199_v1 = vld [vmem:[%s2285_s1 + $0x540] sm:$0xff]  ;;  %v200_v3 = vld [vmem:[%s2285_s1 + $0x548] sm:$0xff]  ;;  %v186_v5 = vld [vmem:[%s2285_s1 + $0x4d8] sm:$0xff] }
  0x3d   :  { %1242 = vmatpush3.bf16.msra.mxu0 %v1241_v60  ;;  %v1293_v60 = vpack.c.bf16 %v166_v52, %v165_v51  ;;  %v217_v6 = vld [vmem:[%s2285_s1 + $0x5d0] sm:$0xff]  ;;  %v218_v7 = vld [vmem:[%s2285_s1 + $0x5d8] sm:$0xff]  ;;  %v187_v16 = vld [vmem:[%s2285_s1 + $0x4e0] sm:$0xff] }
  0x3e   :  { %1244 = vmatprep.subr.bf16.mxu0 %v1243_v62  ;;  %v1295_v62 = vpack.c.bf16 %v184_v57, %v183_v56  ;;  %v169_v11 = vld [vmem:[%s2285_s1 + $0x450] sm:$0xff]  ;;  %v170_v12 = vld [vmem:[%s2285_s1 + $0x458] sm:$0xff]  ;;  %v188_v17 = vld [vmem:[%s2285_s1 + $0x4e8] sm:$0xff] }
  0x3f   :  { %1274 = vmatpush3.bf16.msra.mxu1 %v1273_v61  ;;  %v1325_v61 = vpack.c.bf16 %v198_v55, %v197_v53  ;;  %v201_v13 = vld [vmem:[%s2285_s1 + $0x550] sm:$0xff]  ;;  %v202_v15 = vld [vmem:[%s2285_s1 + $0x558] sm:$0xff]  ;;  %v219_v18 = vld [vmem:[%s2285_s1 + $0x5e0] sm:$0xff] }
  0x40   :  { %1276 = vmatprep.subr.bf16.mxu1 %v1275_v2  ;;  %v1327_v2 = vpack.c.bf16 %v216_v59, %v215_v58  ;;  %v220_v19 = vld [vmem:[%s2285_s1 + $0x5e8] sm:$0xff]  ;;  %v203_v25 = vld [vmem:[%s2285_s1 + $0x560] sm:$0xff]  ;;  %v190_v29 = vld [vmem:[%s2285_s1 + $0x4f8] sm:$0xff] }
  0x41   :  { %1246 = vmatpush3.bf16.msra.mxu0 %v1245_v8  ;;  %v1297_v8 = vpack.c.bf16 %v168_v0, %v167_v63  ;;  %v1335_v26 = vpack.c.bf16 %v220_v19, %v219_v18  ;;  %v204_v27 = vld [vmem:[%s2285_s1 + $0x568] sm:$0xff]  ;;  %v221_v30 = vld [vmem:[%s2285_s1 + $0x5f0] sm:$0xff]  ;;  %v222_v31 = vld [vmem:[%s2285_s1 + $0x5f8] sm:$0xff] }
  0x42   :  { %1280 = vmatprep.subr.bf16.mxu0 %v1279_v10  ;;  %v1299_v10 = vpack.c.bf16 %v186_v5, %v185_v4  ;;  %v173_v33 = vld [vmem:[%s2285_s1 + $0x470] sm:$0xff]  ;;  %v1339_v39 = vpack.c.bf16 %v222_v31, %v221_v30  ;;  %v239_v40 = vld [vmem:[%s2285_s1 + $0x680] sm:$0xff]  ;;  %v240_v41 = vld [vmem:[%s2285_s1 + $0x688] sm:$0xff] }
  0x43   :  { %1278 = vmatpush3.bf16.msra.mxu1 %v1277_v9  ;;  %v1329_v9 = vpack.c.bf16 %v200_v3, %v199_v1 }
  0x44   :  { %1312 = vmatprep.subr.bf16.mxu1 %v1311_v14  ;;  %499 = vmatmul.mubr.f32.vlgmr.msra.gmra.mrb[2].mxu0 %v19_v20  ;;  %v1331_v14 = vpack.c.bf16 %v218_v7, %v217_v6  ;;  %v1301_v20 = vpack.c.bf16 %v170_v12, %v169_v11 }
  0x45   :  { %1282 = vmatpush3.bf16.msra.mxu0 %v1281_v21  ;;  %638 = vmatprep.mubr.f32.mxu0 %v24_v34  ;;  %v1333_v21 = vpack.c.bf16 %v202_v15, %v201_v13  ;;  %v1337_v34 = vpack.c.bf16 %v204_v27, %v203_v25 }
  0x46   :  { %569 = vmatmul.mubr.f32.vlgmr.msra.gmra.mrb[2].mxu1 %v21_v22  ;;  %1284 = vmatprep.subr.bf16.mxu0 %v1283_v24  ;;  %v1303_v22 = vpack.c.bf16 %v188_v17, %v187_v16  ;;  %v172_v24 = vld [vmem:[%s2285_s1 + $0x468] sm:$0xff] }
  0x47   :  { %1314 = vmatpush3.bf16.msra.mxu1 %v1313_v23  ;;  %708 = vmatprep.mubr.f32.mxu1 %v26_v36  ;;  %v171_v23 = vld [vmem:[%s2285_s1 + $0x460] sm:$0xff]  ;;  %v174_v36 = vld [vmem:[%s2285_s1 + $0x478] sm:$0xff] }
  0x48   :  { %1316 = vmatprep.subr.bf16.mxu1 %v1315_v28  ;;  %v189_v28 = vld [vmem:[%s2285_s1 + $0x4f0] sm:$0xff]  ;;  %v1305_v32 = vpack.c.bf16 %v172_v24, %v171_v23 }
  0x49   :  { %1286 = vmatpush3.bf16.msra.mxu0 %v1285_v35  ;;  %v1307_v35 = vpack.c.bf16 %v190_v29, %v189_v28 }
  0x4a   :  { %1288 = vmatprep.subr.bf16.mxu0 %v1287_v38  ;;  %v206_v38 = vld [vmem:[%s2285_s1 + $0x578] sm:$0xff] }
  0x4b   :  { %1318 = vmatpush3.bf16.msra.mxu1 %v1317_v37  ;;  %v205_v37 = vld [vmem:[%s2285_s1 + $0x570] sm:$0xff] }
  0x4c   :  { %1320 = vmatprep.subr.bf16.mxu1 %v1319_v42 }
  0x4d   :  { %1290 = vmatpush3.bf16.msra.mxu0 %v1289_v48 }
  0x4e   :  { %1292 = vmatprep.subr.bf16.mxu0 %v1291_v50 }
  0x4f   :  { %1322 = vmatpush3.bf16.msra.mxu1 %v1321_v49 }
  0x50   :  { %1324 = vmatprep.subr.bf16.mxu1 %v1323_v54 }
  0x51   :  { %1294 = vmatpush3.bf16.msra.mxu0 %v1293_v60 }
  0x52   :  { %1296 = vmatprep.subr.bf16.mxu0 %v1295_v62 }
  0x53   :  { %1326 = vmatpush3.bf16.msra.mxu1 %v1325_v61 }
  0x54   :  { %1328 = vmatprep.subr.bf16.mxu1 %v1327_v2 }
  0x55   :  { %1298 = vmatpush3.bf16.msra.mxu0 %v1297_v8 }
  0x56   :  { %1300 = vmatprep.subr.bf16.mxu0 %v1299_v10 }
  0x57   :  { %1330 = vmatpush3.bf16.msra.mxu1 %v1329_v9 }
  0x58   :  { %1332 = vmatprep.subr.bf16.mxu1 %v1331_v14 }
  0x59   :  { %1302 = vmatpush3.bf16.msra.mxu0 %v1301_v20 }
  0x5a   :  { %1304 = vmatprep.subr.bf16.mxu0 %v1303_v22 }
  0x5b   :  { %1334 = vmatpush3.bf16.msra.mxu1 %v1333_v21 }
  0x5c   :  { %1336 = vmatprep.subr.bf16.mxu1 %v1335_v26 }
  0x5d   :  { %8 = vsyncpa [#allocation3], 0  ;;  %v271_v42 = vld [vmem:[%s2285_s1 + $0x780] sm:$0xff]  ;;  %v272_v43 = vld [vmem:[%s2285_s1 + $0x788] sm:$0xff]  ;;  %1306 = vmatpush3.bf16.msra.mxu0 %v1305_v32  ;;  %v1309_v44 = vpack.c.bf16 %v174_v36, %v173_v33  ;;  %v1341_v45 = vpack.c.bf16 %v206_v38, %v205_v37  ;;  %v1343_v46 = vpack.c.bf16 %v240_v41, %v239_v40  ;;  %vm854_vm0 = vcmask 113664  }
  0x5e   :  { %1308 = vmatprep.subr.bf16.mxu0 %v1307_v35  ;;  %v223_v47 = vld [vmem:[%s2285_s1 + $0x600] sm:$0xff]  ;;  %v224_v48 = vld [vmem:[%s2285_s1 + $0x608] sm:$0xff]  ;;  %v1375_v50 = vpack.c.bf16 %v272_v43, %v271_v42  ;;  %v241_v52 = vld [vmem:[%s2285_s1 + $0x690] sm:$0xff] }
  0x5f   :  { %1338 = vmatpush3.bf16.msra.mxu1 %v1337_v34  ;;  %v255_v49 = vld [vmem:[%s2285_s1 + $0x700] sm:$0xff]  ;;  %v256_v51 = vld [vmem:[%s2285_s1 + $0x708] sm:$0xff]  ;;  %v242_v53 = vld [vmem:[%s2285_s1 + $0x698] sm:$0xff]  ;;  %v1345_v57 = vpack.c.bf16 %v224_v48, %v223_v47 }
  0x60   :  { %1340 = vmatprep.subr.bf16.mxu1 %v1339_v39  ;;  %v273_v54 = vld [vmem:[%s2285_s1 + $0x790] sm:$0xff]  ;;  %v274_v55 = vld [vmem:[%s2285_s1 + $0x798] sm:$0xff]  ;;  %v23_v56 = vld [vmem:[%s2284_s0 + $0x40] sm:$0xff]  ;;  %v1377_v59 = vpack.c.bf16 %v256_v51, %v255_v49  ;;  %v1347_v60 = vpack.c.bf16 %v242_v53, %v241_v52 }
  0x61   :  { %1310 = vmatpush3.bf16.msra.mxu0 %v1309_v44  ;;  %v25_v58 = vld [vmem:[%s2284_s0 + $0x50] sm:$0xff]  ;;  %v226_v62 = vld [vmem:[%s2285_s1 + $0x618] sm:$0xff]  ;;  %v1379_v0 = vpack.c.bf16 %v274_v55, %v273_v54  ;;  %v243_v2 = vld [vmem:[%s2285_s1 + $0x6a0] sm:$0xff] }
  0x62   :  { %1344 = vmatprep.subr.bf16.mxu0 %v1343_v46  ;;  %v225_v61 = vld [vmem:[%s2285_s1 + $0x610] sm:$0xff]  ;;  %v258_v1 = vld [vmem:[%s2285_s1 + $0x718] sm:$0xff]  ;;  %v244_v3 = vld [vmem:[%s2285_s1 + $0x6a8] sm:$0xff] }
  0x63   :  { %1342 = vmatpush3.bf16.msra.mxu1 %v1341_v45  ;;  %v257_v63 = vld [vmem:[%s2285_s1 + $0x710] sm:$0xff]  ;;  %v275_v4 = vld [vmem:[%s2285_s1 + $0x7a0] sm:$0xff]  ;;  %v276_v5 = vld [vmem:[%s2285_s1 + $0x7a8] sm:$0xff]  ;;  %v1349_v7 = vpack.c.bf16 %v226_v62, %v225_v61  ;;  %v1351_v10 = vpack.c.bf16 %v244_v3, %v243_v2 }
  0x64   :  { %1376 = vmatprep.subr.bf16.mxu1 %v1375_v50  ;;  %639 = vmatmul.mubr.f32.vlgmr.msra.gmra.mrb[4].mxu0 %v23_v56  ;;  %v28_v6 = vld [vmem:[%s2284_s0 + $0x68] sm:$0xff]  ;;  %v30_v8 = vld [vmem:[%s2284_s0 + $0x78] sm:$0xff]  ;;  %v1381_v9 = vpack.c.bf16 %v258_v1, %v257_v63  ;;  %v227_v11 = vld [vmem:[%s2285_s1 + $0x620] sm:$0xff]  ;;  %v1383_v14 = vpack.c.bf16 %v276_v5, %v275_v4 }
  0x65   :  { %1346 = vmatpush3.bf16.msra.mxu0 %v1345_v57  ;;  %v228_v12 = vld [vmem:[%s2285_s1 + $0x628] sm:$0xff]  ;;  %v259_v13 = vld [vmem:[%s2285_s1 + $0x720] sm:$0xff]  ;;  %v245_v16 = vld [vmem:[%s2285_s1 + $0x6b0] sm:$0xff]  ;;  %778 = vmatprep.mubr.f32.mxu0 %v28_v6 }
  0x66   :  { %709 = vmatmul.mubr.f32.vlgmr.msra.gmra.mrb[4].mxu1 %v25_v58  ;;  %1348 = vmatprep.subr.bf16.mxu0 %v1347_v60  ;;  %v260_v15 = vld [vmem:[%s2285_s1 + $0x728] sm:$0xff]  ;;  %v246_v17 = vld [vmem:[%s2285_s1 + $0x6b8] sm:$0xff]  ;;  %v277_v18 = vld [vmem:[%s2285_s1 + $0x7b0] sm:$0xff]  ;;  %v1353_v20 = vpack.c.bf16 %v228_v12, %v227_v11 }
  0x67   :  { %1378 = vmatpush3.bf16.msra.mxu1 %v1377_v59  ;;  %v278_v19 = vld [vmem:[%s2285_s1 + $0x7b8] sm:$0xff]  ;;  %848 = vmatprep.mubr.f32.mxu1 %v30_v8  ;;  %v1385_v21 = vpack.c.bf16 %v260_v15, %v259_v13  ;;  %v1355_v22 = vpack.c.bf16 %v246_v17, %v245_v16  ;;  %v229_v23 = vld [vmem:[%s2285_s1 + $0x630] sm:$0xff]  ;;  %v247_v28 = vld [vmem:[%s2285_s1 + $0x6c0] sm:$0xff] }
  0x68   :  { %1380 = vmatprep.subr.bf16.mxu1 %v1379_v0  ;;  %v230_v24 = vld [vmem:[%s2285_s1 + $0x638] sm:$0xff]  ;;  %v261_v25 = vld [vmem:[%s2285_s1 + $0x730] sm:$0xff]  ;;  %v1387_v26 = vpack.c.bf16 %v278_v19, %v277_v18  ;;  %v248_v29 = vld [vmem:[%s2285_s1 + $0x6c8] sm:$0xff] }
  0x69   :  { %1350 = vmatpush3.bf16.msra.mxu0 %v1349_v7  ;;  %v262_v27 = vld [vmem:[%s2285_s1 + $0x738] sm:$0xff]  ;;  %v279_v30 = vld [vmem:[%s2285_s1 + $0x7c0] sm:$0xff]  ;;  %v280_v31 = vld [vmem:[%s2285_s1 + $0x7c8] sm:$0xff]  ;;  %v1357_v32 = vpack.c.bf16 %v230_v24, %v229_v23  ;;  %v1359_v34 = vpack.c.bf16 %v248_v29, %v247_v28 }
  0x6a   :  { %1352 = vmatprep.subr.bf16.mxu0 %v1351_v10  ;;  %v1389_v33 = vpack.c.bf16 %v262_v27, %v261_v25  ;;  %v231_v35 = vld [vmem:[%s2285_s1 + $0x640] sm:$0xff]  ;;  %v232_v36 = vld [vmem:[%s2285_s1 + $0x648] sm:$0xff]  ;;  %v1391_v38 = vpack.c.bf16 %v280_v31, %v279_v30  ;;  %v249_v40 = vld [vmem:[%s2285_s1 + $0x6d0] sm:$0xff] }
  0x6b   :  { %1382 = vmatpush3.bf16.msra.mxu1 %v1381_v9  ;;  %v263_v37 = vld [vmem:[%s2285_s1 + $0x740] sm:$0xff]  ;;  %v264_v39 = vld [vmem:[%s2285_s1 + $0x748] sm:$0xff]  ;;  %v250_v41 = vld [vmem:[%s2285_s1 + $0x6d8] sm:$0xff]  ;;  %v1361_v44 = vpack.c.bf16 %v232_v36, %v231_v35 }
  0x6c   :  { %1384 = vmatprep.subr.bf16.mxu1 %v1383_v14  ;;  %v281_v42 = vld [vmem:[%s2285_s1 + $0x7d0] sm:$0xff]  ;;  %v282_v43 = vld [vmem:[%s2285_s1 + $0x7d8] sm:$0xff]  ;;  %v1393_v45 = vpack.c.bf16 %v264_v39, %v263_v37  ;;  %v1363_v46 = vpack.c.bf16 %v250_v41, %v249_v40  ;;  %v251_v52 = vld [vmem:[%s2285_s1 + $0x6e0] sm:$0xff] }
  0x6d   :  { %1354 = vmatpush3.bf16.msra.mxu0 %v1353_v20  ;;  %v233_v47 = vld [vmem:[%s2285_s1 + $0x650] sm:$0xff]  ;;  %v234_v48 = vld [vmem:[%s2285_s1 + $0x658] sm:$0xff]  ;;  %v1395_v50 = vpack.c.bf16 %v282_v43, %v281_v42  ;;  %v252_v53 = vld [vmem:[%s2285_s1 + $0x6e8] sm:$0xff] }
  0x6e   :  { %1356 = vmatprep.subr.bf16.mxu0 %v1355_v22  ;;  %v265_v49 = vld [vmem:[%s2285_s1 + $0x750] sm:$0xff]  ;;  %v266_v51 = vld [vmem:[%s2285_s1 + $0x758] sm:$0xff]  ;;  %v283_v54 = vld [vmem:[%s2285_s1 + $0x7e0] sm:$0xff]  ;;  %v1365_v56 = vpack.c.bf16 %v234_v48, %v233_v47  ;;  %v1367_v58 = vpack.c.bf16 %v252_v53, %v251_v52 }
  0x6f   :  { %1386 = vmatpush3.bf16.msra.mxu1 %v1385_v21  ;;  %v284_v55 = vld [vmem:[%s2285_s1 + $0x7e8] sm:$0xff]  ;;  %v1397_v57 = vpack.c.bf16 %v266_v51, %v265_v49  ;;  %v235_v59 = vld [vmem:[%s2285_s1 + $0x660] sm:$0xff]  ;;  %v253_v0 = vld [vmem:[%s2285_s1 + $0x6f0] sm:$0xff] }
  0x70   :  { %1388 = vmatprep.subr.bf16.mxu1 %v1387_v26  ;;  %v236_v60 = vld [vmem:[%s2285_s1 + $0x668] sm:$0xff]  ;;  %v267_v61 = vld [vmem:[%s2285_s1 + $0x760] sm:$0xff]  ;;  %v1399_v62 = vpack.c.bf16 %v284_v55, %v283_v54  ;;  %v254_v1 = vld [vmem:[%s2285_s1 + $0x6f8] sm:$0xff] }
  0x71   :  { %1358 = vmatpush3.bf16.msra.mxu0 %v1357_v32  ;;  %v268_v63 = vld [vmem:[%s2285_s1 + $0x768] sm:$0xff]  ;;  %v285_v2 = vld [vmem:[%s2285_s1 + $0x7f0] sm:$0xff]  ;;  %v286_v3 = vld [vmem:[%s2285_s1 + $0x7f8] sm:$0xff]  ;;  %v1369_v4 = vpack.c.bf16 %v236_v60, %v235_v59  ;;  %v1371_v6 = vpack.c.bf16 %v254_v1, %v253_v0 }
  0x72   :  { %1360 = vmatprep.subr.bf16.mxu0 %v1359_v34  ;;  %v1401_v5 = vpack.c.bf16 %v268_v63, %v267_v61  ;;  %v237_v7 = vld [vmem:[%s2285_s1 + $0x670] sm:$0xff]  ;;  %v238_v8 = vld [vmem:[%s2285_s1 + $0x678] sm:$0xff]  ;;  %v1403_v9 = vpack.c.bf16 %v286_v3, %v285_v2  ;;  %v27_v14 = vld [vmem:[%s2284_s0 + $0x60] sm:$0xff] }
  0x73   :  { %1390 = vmatpush3.bf16.msra.mxu1 %v1389_v33  ;;  %v269_v10 = vld [vmem:[%s2285_s1 + $0x770] sm:$0xff]  ;;  %v270_v11 = vld [vmem:[%s2285_s1 + $0x778] sm:$0xff]  ;;  %v1373_v12 = vpack.c.bf16 %v238_v8, %v237_v7  ;;  %v870_v17 = vld [vmem:[%s2286_s2] ss:$0 sm:$0xff] }
  0x74   :  { %1392 = vmatprep.subr.bf16.mxu1 %v1391_v38  ;;  %v1405_v13 = vpack.c.bf16 %v270_v11, %v269_v10  ;;  %v29_v15 = vld [vmem:[%s2284_s0 + $0x70] sm:$0xff]  ;;  %s1432_s0 = smov [#allocation2]  }
  0x75   :  { %1362 = vmatpush3.bf16.msra.mxu0 %v1361_v44  ;;  %s862_s2 = sshll.u32 %s1432_s0, 4  ;;  %s863_s2 = int_to_ptr.vmem [resolvable:$true] %s862_s2 }
  0x76   :  { %1364 = vmatprep.subr.bf16.mxu0 %v1363_v46  ;;  %s1408_s17 = scalar_lea.vmem %s863_s2, 128  ;;  %p1413_p1 = scmp.lt.s32.totalorder %s863_s2, %s863_s2 }
  0x77   :  { %1394 = vmatpush3.bf16.msra.mxu1 %v1393_v45  ;;  %p1409_p0 = scmp.ne.s32.totalorder %s863_s2, %s1408_s17  ;;  %p1414_p2 = scmp.lt.s32.totalorder %s1408_s17, %s1408_s17 }
  0x78   :  { %1396 = vmatprep.subr.bf16.mxu1 %v1395_v50 }
  0x79   :  { %1366 = vmatpush3.bf16.msra.mxu0 %v1365_v56  ;;  %p1415_p3 = por %p1414_p2, %p1413_p1 }
  0x7a   :  { %1368 = vmatprep.subr.bf16.mxu0 %v1367_v58 }
  0x7b   :  { %1398 = vmatpush3.bf16.msra.mxu1 %v1397_v57  ;;  %p1416_p4 = pnand %p1415_p3, %p1409_p0 }
  0x7c   :  { %1400 = vmatprep.subr.bf16.mxu1 %v1399_v62 }
  0x7d   :  { %1370 = vmatpush3.bf16.msra.mxu0 %v1369_v4 }
  0x7e   :  { %1372 = vmatprep.subr.bf16.mxu0 %v1371_v6 }
  0x7f   :  { %1402 = vmatpush3.bf16.msra.mxu1 %v1401_v5 }
  0x80   :  { %1404 = vmatprep.subr.bf16.mxu1 %v1403_v9 }
  0x81   :  { %1374 = vmatpush3.bf16.msra.mxu0 %v1373_v12 }
  0x83   :  { %1406 = vmatpush3.bf16.msra.mxu1 %v1405_v13 }
  0x84   :  { %779 = vmatmul.mubr.f32.vlgmr.msra.gmra.mrb[6].mxu0 %v27_v14 }
  0x86   :  { %849 = vmatmul.mubr.f32.vlgmr.msra.gmra.mrb[6].mxu1 %v29_v15 }
  0xf7   :  { %v903_v16 = vpop.f32.mrb[0].mxu0 }
  0xf8   :  { %v904_v18 = vpop.f32.mrb[1].mxu0 }
  0xf9   :  { %v938_v19 = vpop.f32.mrb[0].mxu1  ;;  %v905_v20 = vadd.f32 %v904_v18, %v903_v16 }
  0xfa   :  { %v939_v21 = vpop.f32.mrb[1].mxu1 }
  0xfb   :  { %v940_v22 = vadd.f32 %v939_v21, %v938_v19  ;;  %v361_v23 = vadd.f32 %v905_v20, %v870_v17 }
  0xfd   :  { %v431_v24 = vadd.f32 %v940_v22, %v361_v23 }
 0x117   :  { %v973_v25 = vpop.f32.mrb[2].mxu0 }
 0x118   :  { %v974_v26 = vpop.f32.mrb[3].mxu0 }
 0x119   :  { %v1008_v27 = vpop.f32.mrb[2].mxu1  ;;  %v975_v28 = vadd.f32 %v974_v26, %v973_v25 }
 0x11a   :  { %v1009_v29 = vpop.f32.mrb[3].mxu1 }
 0x11b   :  { %v1010_v30 = vadd.f32 %v1009_v29, %v1008_v27  ;;  %v501_v31 = vadd.f32 %v975_v28, %v431_v24 }
 0x11d   :  { %v571_v32 = vadd.f32 %v1010_v30, %v501_v31 }
 0x137   :  { %v1043_v33 = vpop.f32.mrb[4].mxu0 }
 0x138   :  { %v1044_v34 = vpop.f32.mrb[5].mxu0 }
 0x139   :  { %v1078_v35 = vpop.f32.mrb[4].mxu1  ;;  %v1045_v36 = vadd.f32 %v1044_v34, %v1043_v33 }
 0x13a   :  { %v1079_v37 = vpop.f32.mrb[5].mxu1 }
 0x13b   :  { %v1080_v38 = vadd.f32 %v1079_v37, %v1078_v35  ;;  %v641_v39 = vadd.f32 %v1045_v36, %v571_v32 }
 0x13d   :  { %v711_v40 = vadd.f32 %v1080_v38, %v641_v39 }
 0x157   :  { %v1113_v41 = vpop.f32.mrb[6].mxu0 }
 0x158   :  { %v1114_v42 = vpop.f32.mrb[7].mxu0 }
 0x159   :  { %v1148_v43 = vpop.f32.mrb[6].mxu1  ;;  %v1115_v44 = vadd.f32 %v1114_v42, %v1113_v41 }
 0x15a   :  { %v1149_v45 = vpop.f32.mrb[7].mxu1 }
 0x15b   :  { %v1150_v46 = vadd.f32 %v1149_v45, %v1148_v43  ;;  %v781_v47 = vadd.f32 %v1115_v44, %v711_v40 }
 0x15d   :  { %v851_v48 = vadd.f32 %v1150_v46, %v781_v47 }
 0x15f   :  { %855 = vst.msk [vmem:[#allocation2] sm:$0xff] %vm854_vm0, %v851_v48 }
 0x160   :  { %1419 = shalt.err (!%p1416_p4)
}
 0x161   :  { %s1420_s20 = scalar_lea.hbm %s2287_s3, 128 }
 0x162   :  { %p1421_p5 = scmp.ne.s32.totalorder %s2287_s3, %s1420_s20  ;;  %p1424_p6 = scmp.lt.u32.totalorder %s1420_s20, %s2287_s3 }
 0x164   :  { %p1426_p7 = pnand %p1424_p6, %p1421_p5 }
 0x166   :  { %1429 = shalt.err (!%p1426_p7)
}
 0x167   :  { %865 = dma.vmem_to_hbm [thread:$0]  %s863_s2, 128, %s2287_s3, [#allocation3]  }
 0x168   :  { %1430 = dma.done.wait [#allocation3], 128  }
 0x169   :  { %1431 = vsyncadd [#allocation3], 4294967168 }
 0x16a   :  { %869 = vsyncpa [#allocation3], 1 }

</bundles_post_ra>
